<compile_context>
chip_gen: v6e
topology: v6e:2x2x1
jax: 0.10.0
libtpu: 0.0.40
codegen_flags: <defaults>
</compile_context>

<pallas_src>
import jax
import jax.numpy as jnp
from jax.experimental import pallas as pl
from jax.experimental.pallas import tpu as pltpu


def _round_up(x: int, m: int) -> int:
    return ((x + m - 1) // m) * m


def _gather_kernel(ids_ref, w_hbm, out_ref, buf_ref, sem_ref):
    """ids_ref: (T_pad,) int32 in SMEM (scalar prefetch)
       w_hbm:   (V, D) table left in HBM (memory_space=pl.ANY)
       out_ref: (t_blk, D) output block in VMEM
       buf_ref: (t_blk, D) VMEM staging tile (DMA destination)
       sem_ref: (1,) DMA semaphore shared by all row copies of this block."""
    t_blk = out_ref.shape[0]
    base = pl.program_id(0) * t_blk

    # Issue one row DMA per token; all t_blk copies are in flight concurrently,
    # giving deep memory-level parallelism on the HBM path.
    for j in range(t_blk):
        row = ids_ref[base + j]
        pltpu.make_async_copy(
            w_hbm.at[pl.ds(row, 1), :],      # (1, D) row at dynamic HBM offset
            buf_ref.at[pl.ds(j, 1), :],      # (1, D) row of the staging tile
            sem_ref.at[0],
        ).start()

    # Drain: one wait per row copy (all copies share one sem and are equal size).
    for j in range(t_blk):
        pltpu.make_async_copy(
            w_hbm.at[pl.ds(0, 1), :],
            buf_ref.at[pl.ds(0, 1), :],
            sem_ref.at[0],
        ).wait()

    # Lane-dense (t_blk, D) store; pipeline writes this block back to HBM.
    out_ref[...] = buf_ref[...]


def hybro_embedding_forward(input_ids: jax.Array, weight: jax.Array,
                            *, t_blk: int = 128) -> jax.Array:
    """input_ids: (B, S) int, weight: (V, D) -> (B, S, D) = weight[input_ids]."""
    B, S = input_ids.shape
    V, D = weight.shape
    T = B * S

    # Tile the token axis; keep the tile a multiple of 8 (sublane) but do not
    # over-pad tiny inputs.  Ragged tail handled by padding + slicing.
    t_blk = max(8, min(t_blk, _round_up(T, 8)))
    T_pad = _round_up(T, t_blk)

    ids_flat = input_ids.reshape(T).astype(jnp.int32)
    if T_pad != T:
        ids_flat = jnp.pad(ids_flat, (0, T_pad - T))   # padded ids -> row 0

    out_padded = pl.pallas_call(
        _gather_kernel,
        out_shape=jax.ShapeDtypeStruct((T_pad, D), weight.dtype),
        grid_spec=pltpu.PrefetchScalarGridSpec(
            num_scalar_prefetch=1,                      # ids -> SMEM
            grid=(T_pad // t_blk,),
            in_specs=[
                pl.BlockSpec(memory_space=pl.ANY),      # table stays in HBM
            ],
            out_specs=pl.BlockSpec((t_blk, D), lambda i, ids: (i, 0)),
            scratch_shapes=[
                pltpu.VMEM((t_blk, D), weight.dtype),   # DMA staging tile
                pltpu.SemaphoreType.DMA((1,)),
            ],
        ),
        compiler_params=pltpu.CompilerParams(
            dimension_semantics=("parallel",),          # token axis -> megacore
        ),
    )(ids_flat, weight)

    out = out_padded[:T] if T_pad != T else out_padded
    return out.reshape(B, S, D)


def build_hybro_weight(key, num_embeddings: int, embedding_dim: int,
                       freeze_idx_upper: int = 3) -> jax.Array:
    """Mirror HybroEmbedding.__init__: concat frozen + unfrozen slices of the
    original table (numerically equal to the original weight)."""
    ori_weight = jax.random.normal(key, (num_embeddings, embedding_dim),
                                   dtype=jnp.float32)
    frozen = ori_weight[0:freeze_idx_upper]
    unfrozen = ori_weight[freeze_idx_upper:num_embeddings]
    return jnp.concatenate([frozen, unfrozen], axis=0)


if __name__ == "__main__":
    key = jax.random.PRNGKey(0)
    k_w, k_ids = jax.random.split(key)

    num_embeddings = 32   # vocab size V
    embedding_dim = 128   # D (lane-aligned)
    batch, seq = 2, 8

    weight = build_hybro_weight(k_w, num_embeddings, embedding_dim,
                                freeze_idx_upper=3)
    input_ids = jax.random.randint(k_ids, (batch, seq), 0, num_embeddings,
                                   dtype=jnp.int32)

    out = hybro_embedding_forward(input_ids, weight)
    out = jax.block_until_ready(out)

    # reference: plain gather
    ref = jnp.take(weight, input_ids, axis=0)
    assert out.shape == (batch, seq, embedding_dim)
    assert jnp.allclose(out, ref, atol=1e-6, rtol=1e-6)

    print("KERNEL_OK")
</pallas_src>

<mosaic_0001>
module attributes {stable_mosaic.version = 11 : i64} {
  func.func @_gather_kernel(%arg0: i32, %arg1: memref<16xi32, #tpu.memory_space<smem>>, %arg2: memref<32x128xf32, #tpu.memory_space<any>>, %arg3: memref<16x128xf32, #tpu.memory_space<vmem>>, %arg4: memref<16x128xf32, #tpu.memory_space<vmem>>, %arg5: memref<1x!tpu.dma_semaphore, #tpu.memory_space<semaphore_mem>>) attributes {dimension_semantics = [#tpu.dimension_semantics<parallel>], iteration_bounds = array<i64: 1>, scalar_prefetch = 1 : i64, scratch_operands = 2 : i64, tpu.core_type = #tpu.core_type<tc>, window_params = [{}, {transform_indices = @transform_1, window_bounds = array<i64: 16, 128>}]} {
    %c16_i32 = arith.constant 16 : i32
    %0 = arith.muli %arg0, %c16_i32 : i32
    %c0_i32 = arith.constant 0 : i32
    %1 = arith.addi %0, %c0_i32 : i32
    %2 = arith.index_cast %1 : i32 to index
    %3 = memref.load %arg1[%2] : memref<16xi32, #tpu.memory_space<smem>>
    %c0_i32_0 = arith.constant 0 : i32
    %c0_i32_1 = arith.constant 0 : i32
    %4 = tpu.memref_slice %arg2[%3, %c0_i32_1] : memref<32x128xf32, #tpu.memory_space<any>> -> memref<1x128xf32, #tpu.memory_space<any>>
    %c0_i32_2 = arith.constant 0 : i32
    %c0_i32_3 = arith.constant 0 : i32
    %5 = tpu.memref_slice %arg4[%c0_i32_2, %c0_i32_3] : memref<16x128xf32, #tpu.memory_space<vmem>> -> memref<1x128xf32, #tpu.memory_space<vmem>>
    %6 = tpu.memref_slice %arg5[%c0_i32_0] : memref<1x!tpu.dma_semaphore, #tpu.memory_space<semaphore_mem>> -> memref<1x!tpu.dma_semaphore, #tpu.memory_space<semaphore_mem>>
    %7 = tpu.memref_squeeze %6 : memref<1x!tpu.dma_semaphore, #tpu.memory_space<semaphore_mem>> -> memref<!tpu.dma_semaphore, #tpu.memory_space<semaphore_mem>>
    tpu.enqueue_dma source(%4 : memref<1x128xf32, #tpu.memory_space<any>>) target(%5 : memref<1x128xf32, #tpu.memory_space<vmem>>) target_semaphore(%7 : memref<!tpu.dma_semaphore, #tpu.memory_space<semaphore_mem>>)
    %c1_i32 = arith.constant 1 : i32
    %8 = arith.addi %0, %c1_i32 : i32
    %9 = arith.index_cast %8 : i32 to index
    %10 = memref.load %arg1[%9] : memref<16xi32, #tpu.memory_space<smem>>
    %c0_i32_4 = arith.constant 0 : i32
    %c0_i32_5 = arith.constant 0 : i32
    %11 = tpu.memref_slice %arg2[%10, %c0_i32_5] : memref<32x128xf32, #tpu.memory_space<any>> -> memref<1x128xf32, #tpu.memory_space<any>>
    %c1_i32_6 = arith.constant 1 : i32
    %c0_i32_7 = arith.constant 0 : i32
    %12 = tpu.memref_slice %arg4[%c1_i32_6, %c0_i32_7] : memref<16x128xf32, #tpu.memory_space<vmem>> -> memref<1x128xf32, #tpu.memory_space<vmem>>
    %13 = tpu.memref_slice %arg5[%c0_i32_4] : memref<1x!tpu.dma_semaphore, #tpu.memory_space<semaphore_mem>> -> memref<1x!tpu.dma_semaphore, #tpu.memory_space<semaphore_mem>>
    %14 = tpu.memref_squeeze %13 : memref<1x!tpu.dma_semaphore, #tpu.memory_space<semaphore_mem>> -> memref<!tpu.dma_semaphore, #tpu.memory_space<semaphore_mem>>
    tpu.enqueue_dma source(%11 : memref<1x128xf32, #tpu.memory_space<any>>) target(%12 : memref<1x128xf32, #tpu.memory_space<vmem>>) target_semaphore(%14 : memref<!tpu.dma_semaphore, #tpu.memory_space<semaphore_mem>>)
    %c2_i32 = arith.constant 2 : i32
    %15 = arith.addi %0, %c2_i32 : i32
    %16 = arith.index_cast %15 : i32 to index
    %17 = memref.load %arg1[%16] : memref<16xi32, #tpu.memory_space<smem>>
    %c0_i32_8 = arith.constant 0 : i32
    %c0_i32_9 = arith.constant 0 : i32
    %18 = tpu.memref_slice %arg2[%17, %c0_i32_9] : memref<32x128xf32, #tpu.memory_space<any>> -> memref<1x128xf32, #tpu.memory_space<any>>
    %c2_i32_10 = arith.constant 2 : i32
    %c0_i32_11 = arith.constant 0 : i32
    %19 = tpu.memref_slice %arg4[%c2_i32_10, %c0_i32_11] : memref<16x128xf32, #tpu.memory_space<vmem>> -> memref<1x128xf32, #tpu.memory_space<vmem>>
    %20 = tpu.memref_slice %arg5[%c0_i32_8] : memref<1x!tpu.dma_semaphore, #tpu.memory_space<semaphore_mem>> -> memref<1x!tpu.dma_semaphore, #tpu.memory_space<semaphore_mem>>
    %21 = tpu.memref_squeeze %20 : memref<1x!tpu.dma_semaphore, #tpu.memory_space<semaphore_mem>> -> memref<!tpu.dma_semaphore, #tpu.memory_space<semaphore_mem>>
    tpu.enqueue_dma source(%18 : memref<1x128xf32, #tpu.memory_space<any>>) target(%19 : memref<1x128xf32, #tpu.memory_space<vmem>>) target_semaphore(%21 : memref<!tpu.dma_semaphore, #tpu.memory_space<semaphore_mem>>)
    %c3_i32 = arith.constant 3 : i32
    %22 = arith.addi %0, %c3_i32 : i32
    %23 = arith.index_cast %22 : i32 to index
    %24 = memref.load %arg1[%23] : memref<16xi32, #tpu.memory_space<smem>>
    %c0_i32_12 = arith.constant 0 : i32
    %c0_i32_13 = arith.constant 0 : i32
    %25 = tpu.memref_slice %arg2[%24, %c0_i32_13] : memref<32x128xf32, #tpu.memory_space<any>> -> memref<1x128xf32, #tpu.memory_space<any>>
    %c3_i32_14 = arith.constant 3 : i32
    %c0_i32_15 = arith.constant 0 : i32
    %26 = tpu.memref_slice %arg4[%c3_i32_14, %c0_i32_15] : memref<16x128xf32, #tpu.memory_space<vmem>> -> memref<1x128xf32, #tpu.memory_space<vmem>>
    %27 = tpu.memref_slice %arg5[%c0_i32_12] : memref<1x!tpu.dma_semaphore, #tpu.memory_space<semaphore_mem>> -> memref<1x!tpu.dma_semaphore, #tpu.memory_space<semaphore_mem>>
    %28 = tpu.memref_squeeze %27 : memref<1x!tpu.dma_semaphore, #tpu.memory_space<semaphore_mem>> -> memref<!tpu.dma_semaphore, #tpu.memory_space<semaphore_mem>>
    tpu.enqueue_dma source(%25 : memref<1x128xf32, #tpu.memory_space<any>>) target(%26 : memref<1x128xf32, #tpu.memory_space<vmem>>) target_semaphore(%28 : memref<!tpu.dma_semaphore, #tpu.memory_space<semaphore_mem>>)
    %c4_i32 = arith.constant 4 : i32
    %29 = arith.addi %0, %c4_i32 : i32
    %30 = arith.index_cast %29 : i32 to index
    %31 = memref.load %arg1[%30] : memref<16xi32, #tpu.memory_space<smem>>
    %c0_i32_16 = arith.constant 0 : i32
    %c0_i32_17 = arith.constant 0 : i32
    %32 = tpu.memref_slice %arg2[%31, %c0_i32_17] : memref<32x128xf32, #tpu.memory_space<any>> -> memref<1x128xf32, #tpu.memory_space<any>>
    %c4_i32_18 = arith.constant 4 : i32
    %c0_i32_19 = arith.constant 0 : i32
    %33 = tpu.memref_slice %arg4[%c4_i32_18, %c0_i32_19] : memref<16x128xf32, #tpu.memory_space<vmem>> -> memref<1x128xf32, #tpu.memory_space<vmem>>
    %34 = tpu.memref_slice %arg5[%c0_i32_16] : memref<1x!tpu.dma_semaphore, #tpu.memory_space<semaphore_mem>> -> memref<1x!tpu.dma_semaphore, #tpu.memory_space<semaphore_mem>>
    %35 = tpu.memref_squeeze %34 : memref<1x!tpu.dma_semaphore, #tpu.memory_space<semaphore_mem>> -> memref<!tpu.dma_semaphore, #tpu.memory_space<semaphore_mem>>
    tpu.enqueue_dma source(%32 : memref<1x128xf32, #tpu.memory_space<any>>) target(%33 : memref<1x128xf32, #tpu.memory_space<vmem>>) target_semaphore(%35 : memref<!tpu.dma_semaphore, #tpu.memory_space<semaphore_mem>>)
    %c5_i32 = arith.constant 5 : i32
    %36 = arith.addi %0, %c5_i32 : i32
    %37 = arith.index_cast %36 : i32 to index
    %38 = memref.load %arg1[%37] : memref<16xi32, #tpu.memory_space<smem>>
    %c0_i32_20 = arith.constant 0 : i32
    %c0_i32_21 = arith.constant 0 : i32
    %39 = tpu.memref_slice %arg2[%38, %c0_i32_21] : memref<32x128xf32, #tpu.memory_space<any>> -> memref<1x128xf32, #tpu.memory_space<any>>
    %c5_i32_22 = arith.constant 5 : i32
    %c0_i32_23 = arith.constant 0 : i32
    %40 = tpu.memref_slice %arg4[%c5_i32_22, %c0_i32_23] : memref<16x128xf32, #tpu.memory_space<vmem>> -> memref<1x128xf32, #tpu.memory_space<vmem>>
    %41 = tpu.memref_slice %arg5[%c0_i32_20] : memref<1x!tpu.dma_semaphore, #tpu.memory_space<semaphore_mem>> -> memref<1x!tpu.dma_semaphore, #tpu.memory_space<semaphore_mem>>
    %42 = tpu.memref_squeeze %41 : memref<1x!tpu.dma_semaphore, #tpu.memory_space<semaphore_mem>> -> memref<!tpu.dma_semaphore, #tpu.memory_space<semaphore_mem>>
    tpu.enqueue_dma source(%39 : memref<1x128xf32, #tpu.memory_space<any>>) target(%40 : memref<1x128xf32, #tpu.memory_space<vmem>>) target_semaphore(%42 : memref<!tpu.dma_semaphore, #tpu.memory_space<semaphore_mem>>)
    %c6_i32 = arith.constant 6 : i32
    %43 = arith.addi %0, %c6_i32 : i32
    %44 = arith.index_cast %43 : i32 to index
    %45 = memref.load %arg1[%44] : memref<16xi32, #tpu.memory_space<smem>>
    %c0_i32_24 = arith.constant 0 : i32
    %c0_i32_25 = arith.constant 0 : i32
    %46 = tpu.memref_slice %arg2[%45, %c0_i32_25] : memref<32x128xf32, #tpu.memory_space<any>> -> memref<1x128xf32, #tpu.memory_space<any>>
    %c6_i32_26 = arith.constant 6 : i32
    %c0_i32_27 = arith.constant 0 : i32
    %47 = tpu.memref_slice %arg4[%c6_i32_26, %c0_i32_27] : memref<16x128xf32, #tpu.memory_space<vmem>> -> memref<1x128xf32, #tpu.memory_space<vmem>>
    %48 = tpu.memref_slice %arg5[%c0_i32_24] : memref<1x!tpu.dma_semaphore, #tpu.memory_space<semaphore_mem>> -> memref<1x!tpu.dma_semaphore, #tpu.memory_space<semaphore_mem>>
    %49 = tpu.memref_squeeze %48 : memref<1x!tpu.dma_semaphore, #tpu.memory_space<semaphore_mem>> -> memref<!tpu.dma_semaphore, #tpu.memory_space<semaphore_mem>>
    tpu.enqueue_dma source(%46 : memref<1x128xf32, #tpu.memory_space<any>>) target(%47 : memref<1x128xf32, #tpu.memory_space<vmem>>) target_semaphore(%49 : memref<!tpu.dma_semaphore, #tpu.memory_space<semaphore_mem>>)
    %c7_i32 = arith.constant 7 : i32
    %50 = arith.addi %0, %c7_i32 : i32
    %51 = arith.index_cast %50 : i32 to index
    %52 = memref.load %arg1[%51] : memref<16xi32, #tpu.memory_space<smem>>
    %c0_i32_28 = arith.constant 0 : i32
    %c0_i32_29 = arith.constant 0 : i32
    %53 = tpu.memref_slice %arg2[%52, %c0_i32_29] : memref<32x128xf32, #tpu.memory_space<any>> -> memref<1x128xf32, #tpu.memory_space<any>>
    %c7_i32_30 = arith.constant 7 : i32
    %c0_i32_31 = arith.constant 0 : i32
    %54 = tpu.memref_slice %arg4[%c7_i32_30, %c0_i32_31] : memref<16x128xf32, #tpu.memory_space<vmem>> -> memref<1x128xf32, #tpu.memory_space<vmem>>
    %55 = tpu.memref_slice %arg5[%c0_i32_28] : memref<1x!tpu.dma_semaphore, #tpu.memory_space<semaphore_mem>> -> memref<1x!tpu.dma_semaphore, #tpu.memory_space<semaphore_mem>>
    %56 = tpu.memref_squeeze %55 : memref<1x!tpu.dma_semaphore, #tpu.memory_space<semaphore_mem>> -> memref<!tpu.dma_semaphore, #tpu.memory_space<semaphore_mem>>
    tpu.enqueue_dma source(%53 : memref<1x128xf32, #tpu.memory_space<any>>) target(%54 : memref<1x128xf32, #tpu.memory_space<vmem>>) target_semaphore(%56 : memref<!tpu.dma_semaphore, #tpu.memory_space<semaphore_mem>>)
    %c8_i32 = arith.constant 8 : i32
    %57 = arith.addi %0, %c8_i32 : i32
    %58 = arith.index_cast %57 : i32 to index
    %59 = memref.load %arg1[%58] : memref<16xi32, #tpu.memory_space<smem>>
    %c0_i32_32 = arith.constant 0 : i32
    %c0_i32_33 = arith.constant 0 : i32
    %60 = tpu.memref_slice %arg2[%59, %c0_i32_33] : memref<32x128xf32, #tpu.memory_space<any>> -> memref<1x128xf32, #tpu.memory_space<any>>
    %c8_i32_34 = arith.constant 8 : i32
    %c0_i32_35 = arith.constant 0 : i32
    %61 = tpu.memref_slice %arg4[%c8_i32_34, %c0_i32_35] : memref<16x128xf32, #tpu.memory_space<vmem>> -> memref<1x128xf32, #tpu.memory_space<vmem>>
    %62 = tpu.memref_slice %arg5[%c0_i32_32] : memref<1x!tpu.dma_semaphore, #tpu.memory_space<semaphore_mem>> -> memref<1x!tpu.dma_semaphore, #tpu.memory_space<semaphore_mem>>
    %63 = tpu.memref_squeeze %62 : memref<1x!tpu.dma_semaphore, #tpu.memory_space<semaphore_mem>> -> memref<!tpu.dma_semaphore, #tpu.memory_space<semaphore_mem>>
    tpu.enqueue_dma source(%60 : memref<1x128xf32, #tpu.memory_space<any>>) target(%61 : memref<1x128xf32, #tpu.memory_space<vmem>>) target_semaphore(%63 : memref<!tpu.dma_semaphore, #tpu.memory_space<semaphore_mem>>)
    %c9_i32 = arith.constant 9 : i32
    %64 = arith.addi %0, %c9_i32 : i32
    %65 = arith.index_cast %64 : i32 to index
    %66 = memref.load %arg1[%65] : memref<16xi32, #tpu.memory_space<smem>>
    %c0_i32_36 = arith.constant 0 : i32
    %c0_i32_37 = arith.constant 0 : i32
    %67 = tpu.memref_slice %arg2[%66, %c0_i32_37] : memref<32x128xf32, #tpu.memory_space<any>> -> memref<1x128xf32, #tpu.memory_space<any>>
    %c9_i32_38 = arith.constant 9 : i32
    %c0_i32_39 = arith.constant 0 : i32
    %68 = tpu.memref_slice %arg4[%c9_i32_38, %c0_i32_39] : memref<16x128xf32, #tpu.memory_space<vmem>> -> memref<1x128xf32, #tpu.memory_space<vmem>>
    %69 = tpu.memref_slice %arg5[%c0_i32_36] : memref<1x!tpu.dma_semaphore, #tpu.memory_space<semaphore_mem>> -> memref<1x!tpu.dma_semaphore, #tpu.memory_space<semaphore_mem>>
    %70 = tpu.memref_squeeze %69 : memref<1x!tpu.dma_semaphore, #tpu.memory_space<semaphore_mem>> -> memref<!tpu.dma_semaphore, #tpu.memory_space<semaphore_mem>>
    tpu.enqueue_dma source(%67 : memref<1x128xf32, #tpu.memory_space<any>>) target(%68 : memref<1x128xf32, #tpu.memory_space<vmem>>) target_semaphore(%70 : memref<!tpu.dma_semaphore, #tpu.memory_space<semaphore_mem>>)
    %c10_i32 = arith.constant 10 : i32
    %71 = arith.addi %0, %c10_i32 : i32
    %72 = arith.index_cast %71 : i32 to index
    %73 = memref.load %arg1[%72] : memref<16xi32, #tpu.memory_space<smem>>
    %c0_i32_40 = arith.constant 0 : i32
    %c0_i32_41 = arith.constant 0 : i32
    %74 = tpu.memref_slice %arg2[%73, %c0_i32_41] : memref<32x128xf32, #tpu.memory_space<any>> -> memref<1x128xf32, #tpu.memory_space<any>>
    %c10_i32_42 = arith.constant 10 : i32
    %c0_i32_43 = arith.constant 0 : i32
    %75 = tpu.memref_slice %arg4[%c10_i32_42, %c0_i32_43] : memref<16x128xf32, #tpu.memory_space<vmem>> -> memref<1x128xf32, #tpu.memory_space<vmem>>
    %76 = tpu.memref_slice %arg5[%c0_i32_40] : memref<1x!tpu.dma_semaphore, #tpu.memory_space<semaphore_mem>> -> memref<1x!tpu.dma_semaphore, #tpu.memory_space<semaphore_mem>>
    %77 = tpu.memref_squeeze %76 : memref<1x!tpu.dma_semaphore, #tpu.memory_space<semaphore_mem>> -> memref<!tpu.dma_semaphore, #tpu.memory_space<semaphore_mem>>
    tpu.enqueue_dma source(%74 : memref<1x128xf32, #tpu.memory_space<any>>) target(%75 : memref<1x128xf32, #tpu.memory_space<vmem>>) target_semaphore(%77 : memref<!tpu.dma_semaphore, #tpu.memory_space<semaphore_mem>>)
    %c11_i32 = arith.constant 11 : i32
    %78 = arith.addi %0, %c11_i32 : i32
    %79 = arith.index_cast %78 : i32 to index
    %80 = memref.load %arg1[%79] : memref<16xi32, #tpu.memory_space<smem>>
    %c0_i32_44 = arith.constant 0 : i32
    %c0_i32_45 = arith.constant 0 : i32
    %81 = tpu.memref_slice %arg2[%80, %c0_i32_45] : memref<32x128xf32, #tpu.memory_space<any>> -> memref<1x128xf32, #tpu.memory_space<any>>
    %c11_i32_46 = arith.constant 11 : i32
    %c0_i32_47 = arith.constant 0 : i32
    %82 = tpu.memref_slice %arg4[%c11_i32_46, %c0_i32_47] : memref<16x128xf32, #tpu.memory_space<vmem>> -> memref<1x128xf32, #tpu.memory_space<vmem>>
    %83 = tpu.memref_slice %arg5[%c0_i32_44] : memref<1x!tpu.dma_semaphore, #tpu.memory_space<semaphore_mem>> -> memref<1x!tpu.dma_semaphore, #tpu.memory_space<semaphore_mem>>
    %84 = tpu.memref_squeeze %83 : memref<1x!tpu.dma_semaphore, #tpu.memory_space<semaphore_mem>> -> memref<!tpu.dma_semaphore, #tpu.memory_space<semaphore_mem>>
    tpu.enqueue_dma source(%81 : memref<1x128xf32, #tpu.memory_space<any>>) target(%82 : memref<1x128xf32, #tpu.memory_space<vmem>>) target_semaphore(%84 : memref<!tpu.dma_semaphore, #tpu.memory_space<semaphore_mem>>)
    %c12_i32 = arith.constant 12 : i32
    %85 = arith.addi %0, %c12_i32 : i32
    %86 = arith.index_cast %85 : i32 to index
    %87 = memref.load %arg1[%86] : memref<16xi32, #tpu.memory_space<smem>>
    %c0_i32_48 = arith.constant 0 : i32
    %c0_i32_49 = arith.constant 0 : i32
    %88 = tpu.memref_slice %arg2[%87, %c0_i32_49] : memref<32x128xf32, #tpu.memory_space<any>> -> memref<1x128xf32, #tpu.memory_space<any>>
    %c12_i32_50 = arith.constant 12 : i32
    %c0_i32_51 = arith.constant 0 : i32
    %89 = tpu.memref_slice %arg4[%c12_i32_50, %c0_i32_51] : memref<16x128xf32, #tpu.memory_space<vmem>> -> memref<1x128xf32, #tpu.memory_space<vmem>>
    %90 = tpu.memref_slice %arg5[%c0_i32_48] : memref<1x!tpu.dma_semaphore, #tpu.memory_space<semaphore_mem>> -> memref<1x!tpu.dma_semaphore, #tpu.memory_space<semaphore_mem>>
    %91 = tpu.memref_squeeze %90 : memref<1x!tpu.dma_semaphore, #tpu.memory_space<semaphore_mem>> -> memref<!tpu.dma_semaphore, #tpu.memory_space<semaphore_mem>>
    tpu.enqueue_dma source(%88 : memref<1x128xf32, #tpu.memory_space<any>>) target(%89 : memref<1x128xf32, #tpu.memory_space<vmem>>) target_semaphore(%91 : memref<!tpu.dma_semaphore, #tpu.memory_space<semaphore_mem>>)
    %c13_i32 = arith.constant 13 : i32
    %92 = arith.addi %0, %c13_i32 : i32
    %93 = arith.index_cast %92 : i32 to index
    %94 = memref.load %arg1[%93] : memref<16xi32, #tpu.memory_space<smem>>
    %c0_i32_52 = arith.constant 0 : i32
    %c0_i32_53 = arith.constant 0 : i32
    %95 = tpu.memref_slice %arg2[%94, %c0_i32_53] : memref<32x128xf32, #tpu.memory_space<any>> -> memref<1x128xf32, #tpu.memory_space<any>>
    %c13_i32_54 = arith.constant 13 : i32
    %c0_i32_55 = arith.constant 0 : i32
    %96 = tpu.memref_slice %arg4[%c13_i32_54, %c0_i32_55] : memref<16x128xf32, #tpu.memory_space<vmem>> -> memref<1x128xf32, #tpu.memory_space<vmem>>
    %97 = tpu.memref_slice %arg5[%c0_i32_52] : memref<1x!tpu.dma_semaphore, #tpu.memory_space<semaphore_mem>> -> memref<1x!tpu.dma_semaphore, #tpu.memory_space<semaphore_mem>>
    %98 = tpu.memref_squeeze %97 : memref<1x!tpu.dma_semaphore, #tpu.memory_space<semaphore_mem>> -> memref<!tpu.dma_semaphore, #tpu.memory_space<semaphore_mem>>
    tpu.enqueue_dma source(%95 : memref<1x128xf32, #tpu.memory_space<any>>) target(%96 : memref<1x128xf32, #tpu.memory_space<vmem>>) target_semaphore(%98 : memref<!tpu.dma_semaphore, #tpu.memory_space<semaphore_mem>>)
    %c14_i32 = arith.constant 14 : i32
    %99 = arith.addi %0, %c14_i32 : i32
    %100 = arith.index_cast %99 : i32 to index
    %101 = memref.load %arg1[%100] : memref<16xi32, #tpu.memory_space<smem>>
    %c0_i32_56 = arith.constant 0 : i32
    %c0_i32_57 = arith.constant 0 : i32
    %102 = tpu.memref_slice %arg2[%101, %c0_i32_57] : memref<32x128xf32, #tpu.memory_space<any>> -> memref<1x128xf32, #tpu.memory_space<any>>
    %c14_i32_58 = arith.constant 14 : i32
    %c0_i32_59 = arith.constant 0 : i32
    %103 = tpu.memref_slice %arg4[%c14_i32_58, %c0_i32_59] : memref<16x128xf32, #tpu.memory_space<vmem>> -> memref<1x128xf32, #tpu.memory_space<vmem>>
    %104 = tpu.memref_slice %arg5[%c0_i32_56] : memref<1x!tpu.dma_semaphore, #tpu.memory_space<semaphore_mem>> -> memref<1x!tpu.dma_semaphore, #tpu.memory_space<semaphore_mem>>
    %105 = tpu.memref_squeeze %104 : memref<1x!tpu.dma_semaphore, #tpu.memory_space<semaphore_mem>> -> memref<!tpu.dma_semaphore, #tpu.memory_space<semaphore_mem>>
    tpu.enqueue_dma source(%102 : memref<1x128xf32, #tpu.memory_space<any>>) target(%103 : memref<1x128xf32, #tpu.memory_space<vmem>>) target_semaphore(%105 : memref<!tpu.dma_semaphore, #tpu.memory_space<semaphore_mem>>)
    %c15_i32 = arith.constant 15 : i32
    %106 = arith.addi %0, %c15_i32 : i32
    %107 = arith.index_cast %106 : i32 to index
    %108 = memref.load %arg1[%107] : memref<16xi32, #tpu.memory_space<smem>>
    %c0_i32_60 = arith.constant 0 : i32
    %c0_i32_61 = arith.constant 0 : i32
    %109 = tpu.memref_slice %arg2[%108, %c0_i32_61] : memref<32x128xf32, #tpu.memory_space<any>> -> memref<1x128xf32, #tpu.memory_space<any>>
    %c15_i32_62 = arith.constant 15 : i32
    %c0_i32_63 = arith.constant 0 : i32
    %110 = tpu.memref_slice %arg4[%c15_i32_62, %c0_i32_63] : memref<16x128xf32, #tpu.memory_space<vmem>> -> memref<1x128xf32, #tpu.memory_space<vmem>>
    %111 = tpu.memref_slice %arg5[%c0_i32_60] : memref<1x!tpu.dma_semaphore, #tpu.memory_space<semaphore_mem>> -> memref<1x!tpu.dma_semaphore, #tpu.memory_space<semaphore_mem>>
    %112 = tpu.memref_squeeze %111 : memref<1x!tpu.dma_semaphore, #tpu.memory_space<semaphore_mem>> -> memref<!tpu.dma_semaphore, #tpu.memory_space<semaphore_mem>>
    tpu.enqueue_dma source(%109 : memref<1x128xf32, #tpu.memory_space<any>>) target(%110 : memref<1x128xf32, #tpu.memory_space<vmem>>) target_semaphore(%112 : memref<!tpu.dma_semaphore, #tpu.memory_space<semaphore_mem>>)
    %c0_i32_64 = arith.constant 0 : i32
    %c0_i32_65 = arith.constant 0 : i32
    %c0_i32_66 = arith.constant 0 : i32
    %113 = tpu.memref_slice %arg2[%c0_i32_65, %c0_i32_66] : memref<32x128xf32, #tpu.memory_space<any>> -> memref<1x128xf32, #tpu.memory_space<any>>
    %c0_i32_67 = arith.constant 0 : i32
    %c0_i32_68 = arith.constant 0 : i32
    %114 = tpu.memref_slice %arg4[%c0_i32_67, %c0_i32_68] : memref<16x128xf32, #tpu.memory_space<vmem>> -> memref<1x128xf32, #tpu.memory_space<vmem>>
    %115 = tpu.memref_slice %arg5[%c0_i32_64] : memref<1x!tpu.dma_semaphore, #tpu.memory_space<semaphore_mem>> -> memref<1x!tpu.dma_semaphore, #tpu.memory_space<semaphore_mem>>
    %116 = tpu.memref_squeeze %115 : memref<1x!tpu.dma_semaphore, #tpu.memory_space<semaphore_mem>> -> memref<!tpu.dma_semaphore, #tpu.memory_space<semaphore_mem>>
    tpu.wait_dma2 semaphore(%116 : memref<!tpu.dma_semaphore, #tpu.memory_space<semaphore_mem>>) src(%113 : memref<1x128xf32, #tpu.memory_space<any>>) dst(%114 : memref<1x128xf32, #tpu.memory_space<vmem>>)
    %c0_i32_69 = arith.constant 0 : i32
    %c0_i32_70 = arith.constant 0 : i32
    %c0_i32_71 = arith.constant 0 : i32
    %117 = tpu.memref_slice %arg2[%c0_i32_70, %c0_i32_71] : memref<32x128xf32, #tpu.memory_space<any>> -> memref<1x128xf32, #tpu.memory_space<any>>
    %c0_i32_72 = arith.constant 0 : i32
    %c0_i32_73 = arith.constant 0 : i32
    %118 = tpu.memref_slice %arg4[%c0_i32_72, %c0_i32_73] : memref<16x128xf32, #tpu.memory_space<vmem>> -> memref<1x128xf32, #tpu.memory_space<vmem>>
    %119 = tpu.memref_slice %arg5[%c0_i32_69] : memref<1x!tpu.dma_semaphore, #tpu.memory_space<semaphore_mem>> -> memref<1x!tpu.dma_semaphore, #tpu.memory_space<semaphore_mem>>
    %120 = tpu.memref_squeeze %119 : memref<1x!tpu.dma_semaphore, #tpu.memory_space<semaphore_mem>> -> memref<!tpu.dma_semaphore, #tpu.memory_space<semaphore_mem>>
    tpu.wait_dma2 semaphore(%120 : memref<!tpu.dma_semaphore, #tpu.memory_space<semaphore_mem>>) src(%117 : memref<1x128xf32, #tpu.memory_space<any>>) dst(%118 : memref<1x128xf32, #tpu.memory_space<vmem>>)
    %c0_i32_74 = arith.constant 0 : i32
    %c0_i32_75 = arith.constant 0 : i32
    %c0_i32_76 = arith.constant 0 : i32
    %121 = tpu.memref_slice %arg2[%c0_i32_75, %c0_i32_76] : memref<32x128xf32, #tpu.memory_space<any>> -> memref<1x128xf32, #tpu.memory_space<any>>
    %c0_i32_77 = arith.constant 0 : i32
    %c0_i32_78 = arith.constant 0 : i32
    %122 = tpu.memref_slice %arg4[%c0_i32_77, %c0_i32_78] : memref<16x128xf32, #tpu.memory_space<vmem>> -> memref<1x128xf32, #tpu.memory_space<vmem>>
    %123 = tpu.memref_slice %arg5[%c0_i32_74] : memref<1x!tpu.dma_semaphore, #tpu.memory_space<semaphore_mem>> -> memref<1x!tpu.dma_semaphore, #tpu.memory_space<semaphore_mem>>
    %124 = tpu.memref_squeeze %123 : memref<1x!tpu.dma_semaphore, #tpu.memory_space<semaphore_mem>> -> memref<!tpu.dma_semaphore, #tpu.memory_space<semaphore_mem>>
    tpu.wait_dma2 semaphore(%124 : memref<!tpu.dma_semaphore, #tpu.memory_space<semaphore_mem>>) src(%121 : memref<1x128xf32, #tpu.memory_space<any>>) dst(%122 : memref<1x128xf32, #tpu.memory_space<vmem>>)
    %c0_i32_79 = arith.constant 0 : i32
    %c0_i32_80 = arith.constant 0 : i32
    %c0_i32_81 = arith.constant 0 : i32
    %125 = tpu.memref_slice %arg2[%c0_i32_80, %c0_i32_81] : memref<32x128xf32, #tpu.memory_space<any>> -> memref<1x128xf32, #tpu.memory_space<any>>
    %c0_i32_82 = arith.constant 0 : i32
    %c0_i32_83 = arith.constant 0 : i32
    %126 = tpu.memref_slice %arg4[%c0_i32_82, %c0_i32_83] : memref<16x128xf32, #tpu.memory_space<vmem>> -> memref<1x128xf32, #tpu.memory_space<vmem>>
    %127 = tpu.memref_slice %arg5[%c0_i32_79] : memref<1x!tpu.dma_semaphore, #tpu.memory_space<semaphore_mem>> -> memref<1x!tpu.dma_semaphore, #tpu.memory_space<semaphore_mem>>
    %128 = tpu.memref_squeeze %127 : memref<1x!tpu.dma_semaphore, #tpu.memory_space<semaphore_mem>> -> memref<!tpu.dma_semaphore, #tpu.memory_space<semaphore_mem>>
    tpu.wait_dma2 semaphore(%128 : memref<!tpu.dma_semaphore, #tpu.memory_space<semaphore_mem>>) src(%125 : memref<1x128xf32, #tpu.memory_space<any>>) dst(%126 : memref<1x128xf32, #tpu.memory_space<vmem>>)
    %c0_i32_84 = arith.constant 0 : i32
    %c0_i32_85 = arith.constant 0 : i32
    %c0_i32_86 = arith.constant 0 : i32
    %129 = tpu.memref_slice %arg2[%c0_i32_85, %c0_i32_86] : memref<32x128xf32, #tpu.memory_space<any>> -> memref<1x128xf32, #tpu.memory_space<any>>
    %c0_i32_87 = arith.constant 0 : i32
    %c0_i32_88 = arith.constant 0 : i32
    %130 = tpu.memref_slice %arg4[%c0_i32_87, %c0_i32_88] : memref<16x128xf32, #tpu.memory_space<vmem>> -> memref<1x128xf32, #tpu.memory_space<vmem>>
    %131 = tpu.memref_slice %arg5[%c0_i32_84] : memref<1x!tpu.dma_semaphore, #tpu.memory_space<semaphore_mem>> -> memref<1x!tpu.dma_semaphore, #tpu.memory_space<semaphore_mem>>
    %132 = tpu.memref_squeeze %131 : memref<1x!tpu.dma_semaphore, #tpu.memory_space<semaphore_mem>> -> memref<!tpu.dma_semaphore, #tpu.memory_space<semaphore_mem>>
    tpu.wait_dma2 semaphore(%132 : memref<!tpu.dma_semaphore, #tpu.memory_space<semaphore_mem>>) src(%129 : memref<1x128xf32, #tpu.memory_space<any>>) dst(%130 : memref<1x128xf32, #tpu.memory_space<vmem>>)
    %c0_i32_89 = arith.constant 0 : i32
    %c0_i32_90 = arith.constant 0 : i32
    %c0_i32_91 = arith.constant 0 : i32
    %133 = tpu.memref_slice %arg2[%c0_i32_90, %c0_i32_91] : memref<32x128xf32, #tpu.memory_space<any>> -> memref<1x128xf32, #tpu.memory_space<any>>
    %c0_i32_92 = arith.constant 0 : i32
    %c0_i32_93 = arith.constant 0 : i32
    %134 = tpu.memref_slice %arg4[%c0_i32_92, %c0_i32_93] : memref<16x128xf32, #tpu.memory_space<vmem>> -> memref<1x128xf32, #tpu.memory_space<vmem>>
    %135 = tpu.memref_slice %arg5[%c0_i32_89] : memref<1x!tpu.dma_semaphore, #tpu.memory_space<semaphore_mem>> -> memref<1x!tpu.dma_semaphore, #tpu.memory_space<semaphore_mem>>
    %136 = tpu.memref_squeeze %135 : memref<1x!tpu.dma_semaphore, #tpu.memory_space<semaphore_mem>> -> memref<!tpu.dma_semaphore, #tpu.memory_space<semaphore_mem>>
    tpu.wait_dma2 semaphore(%136 : memref<!tpu.dma_semaphore, #tpu.memory_space<semaphore_mem>>) src(%133 : memref<1x128xf32, #tpu.memory_space<any>>) dst(%134 : memref<1x128xf32, #tpu.memory_space<vmem>>)
    %c0_i32_94 = arith.constant 0 : i32
    %c0_i32_95 = arith.constant 0 : i32
    %c0_i32_96 = arith.constant 0 : i32
    %137 = tpu.memref_slice %arg2[%c0_i32_95, %c0_i32_96] : memref<32x128xf32, #tpu.memory_space<any>> -> memref<1x128xf32, #tpu.memory_space<any>>
    %c0_i32_97 = arith.constant 0 : i32
    %c0_i32_98 = arith.constant 0 : i32
    %138 = tpu.memref_slice %arg4[%c0_i32_97, %c0_i32_98] : memref<16x128xf32, #tpu.memory_space<vmem>> -> memref<1x128xf32, #tpu.memory_space<vmem>>
    %139 = tpu.memref_slice %arg5[%c0_i32_94] : memref<1x!tpu.dma_semaphore, #tpu.memory_space<semaphore_mem>> -> memref<1x!tpu.dma_semaphore, #tpu.memory_space<semaphore_mem>>
    %140 = tpu.memref_squeeze %139 : memref<1x!tpu.dma_semaphore, #tpu.memory_space<semaphore_mem>> -> memref<!tpu.dma_semaphore, #tpu.memory_space<semaphore_mem>>
    tpu.wait_dma2 semaphore(%140 : memref<!tpu.dma_semaphore, #tpu.memory_space<semaphore_mem>>) src(%137 : memref<1x128xf32, #tpu.memory_space<any>>) dst(%138 : memref<1x128xf32, #tpu.memory_space<vmem>>)
    %c0_i32_99 = arith.constant 0 : i32
    %c0_i32_100 = arith.constant 0 : i32
    %c0_i32_101 = arith.constant 0 : i32
    %141 = tpu.memref_slice %arg2[%c0_i32_100, %c0_i32_101] : memref<32x128xf32, #tpu.memory_space<any>> -> memref<1x128xf32, #tpu.memory_space<any>>
    %c0_i32_102 = arith.constant 0 : i32
    %c0_i32_103 = arith.constant 0 : i32
    %142 = tpu.memref_slice %arg4[%c0_i32_102, %c0_i32_103] : memref<16x128xf32, #tpu.memory_space<vmem>> -> memref<1x128xf32, #tpu.memory_space<vmem>>
    %143 = tpu.memref_slice %arg5[%c0_i32_99] : memref<1x!tpu.dma_semaphore, #tpu.memory_space<semaphore_mem>> -> memref<1x!tpu.dma_semaphore, #tpu.memory_space<semaphore_mem>>
    %144 = tpu.memref_squeeze %143 : memref<1x!tpu.dma_semaphore, #tpu.memory_space<semaphore_mem>> -> memref<!tpu.dma_semaphore, #tpu.memory_space<semaphore_mem>>
    tpu.wait_dma2 semaphore(%144 : memref<!tpu.dma_semaphore, #tpu.memory_space<semaphore_mem>>) src(%141 : memref<1x128xf32, #tpu.memory_space<any>>) dst(%142 : memref<1x128xf32, #tpu.memory_space<vmem>>)
    %c0_i32_104 = arith.constant 0 : i32
    %c0_i32_105 = arith.constant 0 : i32
    %c0_i32_106 = arith.constant 0 : i32
    %145 = tpu.memref_slice %arg2[%c0_i32_105, %c0_i32_106] : memref<32x128xf32, #tpu.memory_space<any>> -> memref<1x128xf32, #tpu.memory_space<any>>
    %c0_i32_107 = arith.constant 0 : i32
    %c0_i32_108 = arith.constant 0 : i32
    %146 = tpu.memref_slice %arg4[%c0_i32_107, %c0_i32_108] : memref<16x128xf32, #tpu.memory_space<vmem>> -> memref<1x128xf32, #tpu.memory_space<vmem>>
    %147 = tpu.memref_slice %arg5[%c0_i32_104] : memref<1x!tpu.dma_semaphore, #tpu.memory_space<semaphore_mem>> -> memref<1x!tpu.dma_semaphore, #tpu.memory_space<semaphore_mem>>
    %148 = tpu.memref_squeeze %147 : memref<1x!tpu.dma_semaphore, #tpu.memory_space<semaphore_mem>> -> memref<!tpu.dma_semaphore, #tpu.memory_space<semaphore_mem>>
    tpu.wait_dma2 semaphore(%148 : memref<!tpu.dma_semaphore, #tpu.memory_space<semaphore_mem>>) src(%145 : memref<1x128xf32, #tpu.memory_space<any>>) dst(%146 : memref<1x128xf32, #tpu.memory_space<vmem>>)
    %c0_i32_109 = arith.constant 0 : i32
    %c0_i32_110 = arith.constant 0 : i32
    %c0_i32_111 = arith.constant 0 : i32
    %149 = tpu.memref_slice %arg2[%c0_i32_110, %c0_i32_111] : memref<32x128xf32, #tpu.memory_space<any>> -> memref<1x128xf32, #tpu.memory_space<any>>
    %c0_i32_112 = arith.constant 0 : i32
    %c0_i32_113 = arith.constant 0 : i32
    %150 = tpu.memref_slice %arg4[%c0_i32_112, %c0_i32_113] : memref<16x128xf32, #tpu.memory_space<vmem>> -> memref<1x128xf32, #tpu.memory_space<vmem>>
    %151 = tpu.memref_slice %arg5[%c0_i32_109] : memref<1x!tpu.dma_semaphore, #tpu.memory_space<semaphore_mem>> -> memref<1x!tpu.dma_semaphore, #tpu.memory_space<semaphore_mem>>
    %152 = tpu.memref_squeeze %151 : memref<1x!tpu.dma_semaphore, #tpu.memory_space<semaphore_mem>> -> memref<!tpu.dma_semaphore, #tpu.memory_space<semaphore_mem>>
    tpu.wait_dma2 semaphore(%152 : memref<!tpu.dma_semaphore, #tpu.memory_space<semaphore_mem>>) src(%149 : memref<1x128xf32, #tpu.memory_space<any>>) dst(%150 : memref<1x128xf32, #tpu.memory_space<vmem>>)
    %c0_i32_114 = arith.constant 0 : i32
    %c0_i32_115 = arith.constant 0 : i32
    %c0_i32_116 = arith.constant 0 : i32
    %153 = tpu.memref_slice %arg2[%c0_i32_115, %c0_i32_116] : memref<32x128xf32, #tpu.memory_space<any>> -> memref<1x128xf32, #tpu.memory_space<any>>
    %c0_i32_117 = arith.constant 0 : i32
    %c0_i32_118 = arith.constant 0 : i32
    %154 = tpu.memref_slice %arg4[%c0_i32_117, %c0_i32_118] : memref<16x128xf32, #tpu.memory_space<vmem>> -> memref<1x128xf32, #tpu.memory_space<vmem>>
    %155 = tpu.memref_slice %arg5[%c0_i32_114] : memref<1x!tpu.dma_semaphore, #tpu.memory_space<semaphore_mem>> -> memref<1x!tpu.dma_semaphore, #tpu.memory_space<semaphore_mem>>
    %156 = tpu.memref_squeeze %155 : memref<1x!tpu.dma_semaphore, #tpu.memory_space<semaphore_mem>> -> memref<!tpu.dma_semaphore, #tpu.memory_space<semaphore_mem>>
    tpu.wait_dma2 semaphore(%156 : memref<!tpu.dma_semaphore, #tpu.memory_space<semaphore_mem>>) src(%153 : memref<1x128xf32, #tpu.memory_space<any>>) dst(%154 : memref<1x128xf32, #tpu.memory_space<vmem>>)
    %c0_i32_119 = arith.constant 0 : i32
    %c0_i32_120 = arith.constant 0 : i32
    %c0_i32_121 = arith.constant 0 : i32
    %157 = tpu.memref_slice %arg2[%c0_i32_120, %c0_i32_121] : memref<32x128xf32, #tpu.memory_space<any>> -> memref<1x128xf32, #tpu.memory_space<any>>
    %c0_i32_122 = arith.constant 0 : i32
    %c0_i32_123 = arith.constant 0 : i32
    %158 = tpu.memref_slice %arg4[%c0_i32_122, %c0_i32_123] : memref<16x128xf32, #tpu.memory_space<vmem>> -> memref<1x128xf32, #tpu.memory_space<vmem>>
    %159 = tpu.memref_slice %arg5[%c0_i32_119] : memref<1x!tpu.dma_semaphore, #tpu.memory_space<semaphore_mem>> -> memref<1x!tpu.dma_semaphore, #tpu.memory_space<semaphore_mem>>
    %160 = tpu.memref_squeeze %159 : memref<1x!tpu.dma_semaphore, #tpu.memory_space<semaphore_mem>> -> memref<!tpu.dma_semaphore, #tpu.memory_space<semaphore_mem>>
    tpu.wait_dma2 semaphore(%160 : memref<!tpu.dma_semaphore, #tpu.memory_space<semaphore_mem>>) src(%157 : memref<1x128xf32, #tpu.memory_space<any>>) dst(%158 : memref<1x128xf32, #tpu.memory_space<vmem>>)
    %c0_i32_124 = arith.constant 0 : i32
    %c0_i32_125 = arith.constant 0 : i32
    %c0_i32_126 = arith.constant 0 : i32
    %161 = tpu.memref_slice %arg2[%c0_i32_125, %c0_i32_126] : memref<32x128xf32, #tpu.memory_space<any>> -> memref<1x128xf32, #tpu.memory_space<any>>
    %c0_i32_127 = arith.constant 0 : i32
    %c0_i32_128 = arith.constant 0 : i32
    %162 = tpu.memref_slice %arg4[%c0_i32_127, %c0_i32_128] : memref<16x128xf32, #tpu.memory_space<vmem>> -> memref<1x128xf32, #tpu.memory_space<vmem>>
    %163 = tpu.memref_slice %arg5[%c0_i32_124] : memref<1x!tpu.dma_semaphore, #tpu.memory_space<semaphore_mem>> -> memref<1x!tpu.dma_semaphore, #tpu.memory_space<semaphore_mem>>
    %164 = tpu.memref_squeeze %163 : memref<1x!tpu.dma_semaphore, #tpu.memory_space<semaphore_mem>> -> memref<!tpu.dma_semaphore, #tpu.memory_space<semaphore_mem>>
    tpu.wait_dma2 semaphore(%164 : memref<!tpu.dma_semaphore, #tpu.memory_space<semaphore_mem>>) src(%161 : memref<1x128xf32, #tpu.memory_space<any>>) dst(%162 : memref<1x128xf32, #tpu.memory_space<vmem>>)
    %c0_i32_129 = arith.constant 0 : i32
    %c0_i32_130 = arith.constant 0 : i32
    %c0_i32_131 = arith.constant 0 : i32
    %165 = tpu.memref_slice %arg2[%c0_i32_130, %c0_i32_131] : memref<32x128xf32, #tpu.memory_space<any>> -> memref<1x128xf32, #tpu.memory_space<any>>
    %c0_i32_132 = arith.constant 0 : i32
    %c0_i32_133 = arith.constant 0 : i32
    %166 = tpu.memref_slice %arg4[%c0_i32_132, %c0_i32_133] : memref<16x128xf32, #tpu.memory_space<vmem>> -> memref<1x128xf32, #tpu.memory_space<vmem>>
    %167 = tpu.memref_slice %arg5[%c0_i32_129] : memref<1x!tpu.dma_semaphore, #tpu.memory_space<semaphore_mem>> -> memref<1x!tpu.dma_semaphore, #tpu.memory_space<semaphore_mem>>
    %168 = tpu.memref_squeeze %167 : memref<1x!tpu.dma_semaphore, #tpu.memory_space<semaphore_mem>> -> memref<!tpu.dma_semaphore, #tpu.memory_space<semaphore_mem>>
    tpu.wait_dma2 semaphore(%168 : memref<!tpu.dma_semaphore, #tpu.memory_space<semaphore_mem>>) src(%165 : memref<1x128xf32, #tpu.memory_space<any>>) dst(%166 : memref<1x128xf32, #tpu.memory_space<vmem>>)
    %c0_i32_134 = arith.constant 0 : i32
    %c0_i32_135 = arith.constant 0 : i32
    %c0_i32_136 = arith.constant 0 : i32
    %169 = tpu.memref_slice %arg2[%c0_i32_135, %c0_i32_136] : memref<32x128xf32, #tpu.memory_space<any>> -> memref<1x128xf32, #tpu.memory_space<any>>
    %c0_i32_137 = arith.constant 0 : i32
    %c0_i32_138 = arith.constant 0 : i32
    %170 = tpu.memref_slice %arg4[%c0_i32_137, %c0_i32_138] : memref<16x128xf32, #tpu.memory_space<vmem>> -> memref<1x128xf32, #tpu.memory_space<vmem>>
    %171 = tpu.memref_slice %arg5[%c0_i32_134] : memref<1x!tpu.dma_semaphore, #tpu.memory_space<semaphore_mem>> -> memref<1x!tpu.dma_semaphore, #tpu.memory_space<semaphore_mem>>
    %172 = tpu.memref_squeeze %171 : memref<1x!tpu.dma_semaphore, #tpu.memory_space<semaphore_mem>> -> memref<!tpu.dma_semaphore, #tpu.memory_space<semaphore_mem>>
    tpu.wait_dma2 semaphore(%172 : memref<!tpu.dma_semaphore, #tpu.memory_space<semaphore_mem>>) src(%169 : memref<1x128xf32, #tpu.memory_space<any>>) dst(%170 : memref<1x128xf32, #tpu.memory_space<vmem>>)
    %c0_i32_139 = arith.constant 0 : i32
    %c0_i32_140 = arith.constant 0 : i32
    %c0_i32_141 = arith.constant 0 : i32
    %173 = tpu.memref_slice %arg2[%c0_i32_140, %c0_i32_141] : memref<32x128xf32, #tpu.memory_space<any>> -> memref<1x128xf32, #tpu.memory_space<any>>
    %c0_i32_142 = arith.constant 0 : i32
    %c0_i32_143 = arith.constant 0 : i32
    %174 = tpu.memref_slice %arg4[%c0_i32_142, %c0_i32_143] : memref<16x128xf32, #tpu.memory_space<vmem>> -> memref<1x128xf32, #tpu.memory_space<vmem>>
    %175 = tpu.memref_slice %arg5[%c0_i32_139] : memref<1x!tpu.dma_semaphore, #tpu.memory_space<semaphore_mem>> -> memref<1x!tpu.dma_semaphore, #tpu.memory_space<semaphore_mem>>
    %176 = tpu.memref_squeeze %175 : memref<1x!tpu.dma_semaphore, #tpu.memory_space<semaphore_mem>> -> memref<!tpu.dma_semaphore, #tpu.memory_space<semaphore_mem>>
    tpu.wait_dma2 semaphore(%176 : memref<!tpu.dma_semaphore, #tpu.memory_space<semaphore_mem>>) src(%173 : memref<1x128xf32, #tpu.memory_space<any>>) dst(%174 : memref<1x128xf32, #tpu.memory_space<vmem>>)
    %c0 = arith.constant 0 : index
    %c0_144 = arith.constant 0 : index
    %177 = vector.load %arg4[%c0, %c0_144] : memref<16x128xf32, #tpu.memory_space<vmem>>, vector<16x128xf32>
    %c0_145 = arith.constant 0 : index
    %c0_146 = arith.constant 0 : index
    %178 = vector.load %arg3[%c0_145, %c0_146] : memref<16x128xf32, #tpu.memory_space<vmem>>, vector<16x128xf32>
    tpu.vector_store %arg3[%c0_145, %c0_146], %177 {strides = array<i32>} : memref<16x128xf32, #tpu.memory_space<vmem>>, vector<16x128xf32>,
    return
  }
  func.func @transform_1(%arg0: i32, %arg1: memref<16xi32, #tpu.memory_space<smem>>) -> (i32, i32) {
    %c0_i32 = arith.constant 0 : i32
    %c0_i32_0 = arith.constant 0 : i32
    return %arg0, %c0_i32 : i32, i32
  }
}

</mosaic_0001>

<bundles_post_ra>
// kernel: tpu_custom_call.1
= control target key start
LH: loop header
LB: loop body
LE: loop exit
PB: predicated region body
PF: predicated region fallthrough
CT: control target
= control target key end

     0   :  { %s796_s9 = smov [#allocation5]   ;;  %s1076_s0 = inlined_call_operand.hbm [shape: s32[16], index: 0, kind: input, shape index: {}]   ;;  %s1077_s1 = inlined_call_operand.hbm [shape: f32[32,128], index: 1, kind: input, shape index: {}]   ;;  %s1078_s2 = inlined_call_operand.hbm [shape: f32[16,128], index: 2, kind: output, shape index: {}]  }
   0x1   :  { %8 = dma.hbm_to_smem %s1076_s0, 16, %s796_s9, [#allocation4] }
   0x2   :  { %790 = dma.done.wait [#allocation4], 16 }
   0x3   :  { %791 = vsyncadd [#allocation4], 4294967280 }
   0x4   :  { %10 = sfence }
   0x5   :  { %11 = vsyncpa [#allocation7], 0  ;;  %s13_s12 = sld [smem:[#allocation5]]  ;;  %s797_s13 = smov [#allocation2]  }
   0x6   :  { %s23_s14 = sshll.u32 %s797_s13, 4  ;;  %s834_s15 = sld [smem:[#allocation5 + $0x1]]  ;;  %s836_s14 = int_to_ptr.vmem [resolvable:$true] %s23_s14 }
   0x7   :  { %s798_s16 = smov [#allocation2 + $0x1]   ;;  %s838_s18 = sld [smem:[#allocation5 + $0x2]] }
   0x8   :  { %s39_s17 = sshll.u32 %s798_s16, 4  ;;  %s799_s19 = smov [#allocation2 + $0x2]   ;;  %s840_s17 = int_to_ptr.vmem [resolvable:$true] %s39_s17 }
   0x9   :  { %s55_s0 = sshll.u32 %s799_s19, 4  ;;  %s842_s20 = sld [smem:[#allocation5 + $0x3]]  ;;  %s844_s0 = int_to_ptr.vmem [resolvable:$true] %s55_s0 }
   0xa   :  { %s853_s29 = scalar_lea.hbm %s1077_s1, 512 }
   0xb   :  { %s358_s21 = sshll.u32 %s13_s12, 4 }
   0xc   :  { %s15_s24 = scalar_lea.hbm %s1077_s1, %s358_s21  ;;  %s360_s25 = sshll.u32 %s834_s15, 4 }
   0xd   :  { %s418_s26 = scalar_lea.hbm %s15_s24, 16  ;;  %p421_p1 = scmp.lt.s32.totalorder %s15_s24, %s1077_s1 }
   0xe   :  { %p419_p0 = scmp.ne.s32.totalorder %s15_s24, %s418_s26  ;;  %p422_p2 = scmp.lt.s32.totalorder %s853_s29, %s418_s26 }
  0x10   :  { %p423_p3 = por %p422_p2, %p421_p1 }
  0x12   :  { %p424_p4 = pnand %p423_p3, %p419_p0 }
  0x14   :  { %427 = shalt.err (!%p424_p4)  }
  0x15   :  { %s428_s4 = scalar_lea.vmem %s836_s14, 16  ;;  %s862_s5 = scalar_lea.vmem %s836_s14, 256 }
  0x16   :  { %p429_p5 = scmp.ne.s32.totalorder %s836_s14, %s428_s4  ;;  %p433_p6 = scmp.lt.s32.totalorder %s836_s14, %s836_s14 }
  0x17   :  { %p434_p7 = scmp.lt.s32.totalorder %s862_s5, %s428_s4 }
  0x19   :  { %p435_p8 = por %p434_p7, %p433_p6 }
  0x1b   :  { %p436_p9 = pnand %p435_p8, %p429_p5 }
  0x1d   :  { %439 = shalt.err (!%p436_p9)  }
  0x1e   :  { %26 = dma.hbm_to_vmem [thread:$0]  %s15_s24, 16, %s836_s14, [#allocation3] }
  0x1f   :  { %s30_s8 = scalar_lea.hbm %s1077_s1, %s360_s25  ;;  %s362_s9 = sshll.u32 %s838_s18, 4 }
  0x20   :  { %s440_s10 = scalar_lea.hbm %s30_s8, 16  ;;  %p443_p11 = scmp.lt.s32.totalorder %s30_s8, %s1077_s1 }
  0x21   :  { %p441_p10 = scmp.ne.s32.totalorder %s30_s8, %s440_s10  ;;  %p444_p12 = scmp.lt.s32.totalorder %s853_s29, %s440_s10 }
  0x23   :  { %p445_p13 = por %p444_p12, %p443_p11 }
  0x25   :  { %p446_p0 = pnand %p445_p13, %p441_p10 }
  0x27   :  { %449 = shalt.err (!%p446_p0)  }
  0x28   :  { %s450_s13 = scalar_lea.vmem %s840_s17, 16  ;;  %p455_p2 = scmp.lt.s32.totalorder %s840_s17, %s836_s14 }
  0x29   :  { %p451_p1 = scmp.ne.s32.totalorder %s840_s17, %s450_s13  ;;  %p456_p3 = scmp.lt.s32.totalorder %s862_s5, %s450_s13 }
  0x2b   :  { %p457_p4 = por %p456_p3, %p455_p2 }
  0x2d   :  { %p458_p5 = pnand %p457_p4, %p451_p1 }
  0x2f   :  { %461 = shalt.err (!%p458_p5)  }
  0x30   :  { %42 = dma.hbm_to_vmem [thread:$0]  %s30_s8, 16, %s840_s17, [#allocation3] }
  0x31   :  { %s46_s18 = scalar_lea.hbm %s1077_s1, %s362_s9  ;;  %s364_s19 = sshll.u32 %s842_s20, 4 }
  0x32   :  { %s462_s21 = scalar_lea.hbm %s46_s18, 16  ;;  %p465_p7 = scmp.lt.s32.totalorder %s46_s18, %s1077_s1 }
  0x33   :  { %p463_p6 = scmp.ne.s32.totalorder %s46_s18, %s462_s21  ;;  %p466_p8 = scmp.lt.s32.totalorder %s853_s29, %s462_s21 }
  0x35   :  { %p467_p9 = por %p466_p8, %p465_p7 }
  0x37   :  { %p468_p10 = pnand %p467_p9, %p463_p6 }
  0x39   :  { %471 = shalt.err (!%p468_p10)  }
  0x3a   :  { %s472_s17 = scalar_lea.vmem %s844_s0, 16  ;;  %p477_p12 = scmp.lt.s32.totalorder %s844_s0, %s836_s14 }
  0x3b   :  { %p473_p11 = scmp.ne.s32.totalorder %s844_s0, %s472_s17  ;;  %p478_p13 = scmp.lt.s32.totalorder %s862_s5, %s472_s17 }
  0x3d   :  { %p479_p0 = por %p478_p13, %p477_p12 }
  0x3f   :  { %p480_p1 = pnand %p479_p0, %p473_p11 }
  0x41   :  { %483 = shalt.err (!%p480_p1)  }
  0x42   :  { %58 = dma.hbm_to_vmem [thread:$0]  %s46_s18, 16, %s844_s0, [#allocation3] }
  0x43   :  { %s62_s25 = scalar_lea.hbm %s1077_s1, %s364_s19  ;;  %s800_s26 = smov [#allocation2 + $0x3]  }
  0x44   :  { %s71_s27 = sshll.u32 %s800_s26, 4  ;;  %s365_s28 = sld [smem:[#allocation5 + $0x4]]  ;;  %s72_s27 = int_to_ptr.vmem [resolvable:$true] %s71_s27 }
  0x45   :  { %s484_s30 = scalar_lea.hbm %s62_s25, 16  ;;  %p487_p3 = scmp.lt.s32.totalorder %s62_s25, %s1077_s1 }
  0x46   :  { %p485_p2 = scmp.ne.s32.totalorder %s62_s25, %s484_s30  ;;  %p488_p4 = scmp.lt.s32.totalorder %s853_s29, %s484_s30 }
  0x48   :  { %p489_p5 = por %p488_p4, %p487_p3 }
  0x4a   :  { %p490_p6 = pnand %p489_p5, %p485_p2 }
  0x4c   :  { %493 = shalt.err (!%p490_p6)  }
  0x4d   :  { %s494_s6 = scalar_lea.vmem %s72_s27, 16  ;;  %p499_p8 = scmp.lt.s32.totalorder %s72_s27, %s836_s14 }
  0x4e   :  { %p495_p7 = scmp.ne.s32.totalorder %s72_s27, %s494_s6  ;;  %p500_p9 = scmp.lt.s32.totalorder %s862_s5, %s494_s6 }
  0x50   :  { %p501_p10 = por %p500_p9, %p499_p8 }
  0x52   :  { %p502_p11 = pnand %p501_p10, %p495_p7 }
  0x54   :  { %505 = shalt.err (!%p502_p11)  }
  0x55   :  { %74 = dma.hbm_to_vmem [thread:$0]  %s62_s25, 16, %s72_s27, [#allocation3] }
  0x56   :  { %s801_s0 = smov [#allocation2 + $0x4]   ;;  %s367_s8 = sld [smem:[#allocation5 + $0x5]] }
  0x57   :  { %s87_s7 = sshll.u32 %s801_s0, 4  ;;  %s802_s9 = smov [#allocation2 + $0x5]   ;;  %s88_s7 = int_to_ptr.vmem [resolvable:$true] %s87_s7 }
  0x58   :  { %s103_s10 = sshll.u32 %s802_s9, 4  ;;  %s905_s11 = sld [smem:[#allocation5 + $0x6]]  ;;  %s907_s10 = int_to_ptr.vmem [resolvable:$true] %s103_s10 }
  0x59   :  { %s366_s12 = sshll.u32 %s365_s28, 4 }
  0x5a   :  { %s78_s16 = scalar_lea.hbm %s1077_s1, %s366_s12 }
  0x5b   :  { %s506_s18 = scalar_lea.hbm %s78_s16, 16  ;;  %p509_p13 = scmp.lt.s32.totalorder %s78_s16, %s1077_s1 }
  0x5c   :  { %p507_p12 = scmp.ne.s32.totalorder %s78_s16, %s506_s18  ;;  %p510_p0 = scmp.lt.s32.totalorder %s853_s29, %s506_s18 }
  0x5e   :  { %p511_p1 = por %p510_p0, %p509_p13 }
  0x60   :  { %p512_p2 = pnand %p511_p1, %p507_p12 }
  0x62   :  { %515 = shalt.err (!%p512_p2)  }
  0x63   :  { %s516_s22 = scalar_lea.vmem %s88_s7, 16  ;;  %p521_p4 = scmp.lt.s32.totalorder %s88_s7, %s836_s14 }
  0x64   :  { %p517_p3 = scmp.ne.s32.totalorder %s88_s7, %s516_s22  ;;  %p522_p5 = scmp.lt.s32.totalorder %s862_s5, %s516_s22 }
  0x66   :  { %p523_p6 = por %p522_p5, %p521_p4 }
  0x68   :  { %p524_p7 = pnand %p523_p6, %p517_p3 }
  0x6a   :  { %527 = shalt.err (!%p524_p7)  }
  0x6b   :  { %90 = dma.hbm_to_vmem [thread:$0]  %s78_s16, 16, %s88_s7, [#allocation3] }
  0x6c   :  { %s368_s23 = sshll.u32 %s367_s8, 4  ;;  %s803_s17 = smov [#allocation2 + $0x6]  }
  0x6d   :  { %s119_s20 = sshll.u32 %s803_s17, 4  ;;  %s94_s26 = scalar_lea.hbm %s1077_s1, %s368_s23  ;;  %s921_s20 = int_to_ptr.vmem [resolvable:$true] %s119_s20 }
  0x6e   :  { %s528_s27 = scalar_lea.hbm %s94_s26, 16  ;;  %p531_p9 = scmp.lt.s32.totalorder %s94_s26, %s1077_s1 }
  0x6f   :  { %p529_p8 = scmp.ne.s32.totalorder %s94_s26, %s528_s27  ;;  %p532_p10 = scmp.lt.s32.totalorder %s853_s29, %s528_s27 }
  0x71   :  { %p533_p11 = por %p532_p10, %p531_p9 }
  0x73   :  { %p534_p12 = pnand %p533_p11, %p529_p8 }
  0x75   :  { %537 = shalt.err (!%p534_p12)  }
  0x76   :  { %s538_s3 = scalar_lea.vmem %s907_s10, 16  ;;  %p543_p0 = scmp.lt.s32.totalorder %s907_s10, %s836_s14 }
  0x77   :  { %p539_p13 = scmp.ne.s32.totalorder %s907_s10, %s538_s3  ;;  %p544_p1 = scmp.lt.s32.totalorder %s862_s5, %s538_s3 }
  0x79   :  { %p545_p2 = por %p544_p1, %p543_p0 }
  0x7b   :  { %p546_p3 = pnand %p545_p2, %p539_p13 }
  0x7d   :  { %549 = shalt.err (!%p546_p3)  }
  0x7e   :  { %106 = dma.hbm_to_vmem [thread:$0]  %s94_s26, 16, %s907_s10, [#allocation3] }
  0x7f   :  { %s370_s4 = sshll.u32 %s905_s11, 4  ;;  %s371_s6 = sld [smem:[#allocation5 + $0x7]] }
  0x80   :  { %s110_s8 = scalar_lea.hbm %s1077_s1, %s370_s4 }
  0x81   :  { %s550_s9 = scalar_lea.hbm %s110_s8, 16  ;;  %p553_p5 = scmp.lt.s32.totalorder %s110_s8, %s1077_s1 }
  0x82   :  { %p551_p4 = scmp.ne.s32.totalorder %s110_s8, %s550_s9  ;;  %p554_p6 = scmp.lt.s32.totalorder %s853_s29, %s550_s9 }
  0x84   :  { %p555_p7 = por %p554_p6, %p553_p5 }
  0x86   :  { %p556_p8 = pnand %p555_p7, %p551_p4 }
  0x88   :  { %559 = shalt.err (!%p556_p8)  }
  0x89   :  { %s560_s10 = scalar_lea.vmem %s921_s20, 16  ;;  %p565_p10 = scmp.lt.s32.totalorder %s921_s20, %s836_s14 }
  0x8a   :  { %p561_p9 = scmp.ne.s32.totalorder %s921_s20, %s560_s10  ;;  %p566_p11 = scmp.lt.s32.totalorder %s862_s5, %s560_s10 }
  0x8c   :  { %p567_p12 = por %p566_p11, %p565_p10 }
  0x8e   :  { %p568_p13 = pnand %p567_p12, %p561_p9 }
  0x90   :  { %571 = shalt.err (!%p568_p13)  }
  0x91   :  { %122 = dma.hbm_to_vmem [thread:$0]  %s110_s8, 16, %s921_s20, [#allocation3] }
  0x92   :  { %s804_s11 = smov [#allocation2 + $0x7]   ;;  %s373_s16 = sld [smem:[#allocation5 + $0x8]] }
  0x93   :  { %s135_s15 = sshll.u32 %s804_s11, 4  ;;  %s805_s18 = smov [#allocation2 + $0x8]   ;;  %s136_s15 = int_to_ptr.vmem [resolvable:$true] %s135_s15 }
  0x94   :  { %s151_s19 = sshll.u32 %s805_s18, 4  ;;  %s947_s21 = sld [smem:[#allocation5 + $0x9]]  ;;  %s949_s19 = int_to_ptr.vmem [resolvable:$true] %s151_s19 }
  0x95   :  { %s372_s22 = sshll.u32 %s371_s6, 4 }
  0x96   :  { %s126_s24 = scalar_lea.hbm %s1077_s1, %s372_s22 }
  0x97   :  { %s572_s25 = scalar_lea.hbm %s126_s24, 16  ;;  %p575_p1 = scmp.lt.s32.totalorder %s126_s24, %s1077_s1 }
  0x98   :  { %p573_p0 = scmp.ne.s32.totalorder %s126_s24, %s572_s25  ;;  %p576_p2 = scmp.lt.s32.totalorder %s853_s29, %s572_s25 }
  0x9a   :  { %p577_p3 = por %p576_p2, %p575_p1 }
  0x9c   :  { %p578_p4 = pnand %p577_p3, %p573_p0 }
  0x9e   :  { %581 = shalt.err (!%p578_p4)  }
  0x9f   :  { %s582_s20 = scalar_lea.vmem %s136_s15, 16  ;;  %p587_p6 = scmp.lt.s32.totalorder %s136_s15, %s836_s14 }
  0xa0   :  { %p583_p5 = scmp.ne.s32.totalorder %s136_s15, %s582_s20  ;;  %p588_p7 = scmp.lt.s32.totalorder %s862_s5, %s582_s20 }
  0xa2   :  { %p589_p8 = por %p588_p7, %p587_p6 }
  0xa4   :  { %p590_p9 = pnand %p589_p8, %p583_p5 }
  0xa6   :  { %593 = shalt.err (!%p590_p9)  }
  0xa7   :  { %138 = dma.hbm_to_vmem [thread:$0]  %s126_s24, 16, %s136_s15, [#allocation3] }
  0xa8   :  { %s374_s28 = sshll.u32 %s373_s16, 4  ;;  %s806_s30 = smov [#allocation2 + $0x9]  }
  0xa9   :  { %s167_s3 = sshll.u32 %s806_s30, 4  ;;  %s142_s0 = scalar_lea.hbm %s1077_s1, %s374_s28  ;;  %s963_s3 = int_to_ptr.vmem [resolvable:$true] %s167_s3 }
  0xaa   :  { %s594_s7 = scalar_lea.hbm %s142_s0, 16  ;;  %p597_p11 = scmp.lt.s32.totalorder %s142_s0, %s1077_s1 }
  0xab   :  { %p595_p10 = scmp.ne.s32.totalorder %s142_s0, %s594_s7  ;;  %p598_p12 = scmp.lt.s32.totalorder %s853_s29, %s594_s7 }
  0xad   :  { %p599_p13 = por %p598_p12, %p597_p11 }
  0xaf   :  { %p600_p0 = pnand %p599_p13, %p595_p10 }
  0xb1   :  { %603 = shalt.err (!%p600_p0)  }
  0xb2   :  { %s604_s12 = scalar_lea.vmem %s949_s19, 16  ;;  %p609_p2 = scmp.lt.s32.totalorder %s949_s19, %s836_s14 }
  0xb3   :  { %p605_p1 = scmp.ne.s32.totalorder %s949_s19, %s604_s12  ;;  %p610_p3 = scmp.lt.s32.totalorder %s862_s5, %s604_s12 }
  0xb5   :  { %p611_p4 = por %p610_p3, %p609_p2 }
  0xb7   :  { %p612_p5 = pnand %p611_p4, %p605_p1 }
  0xb9   :  { %615 = shalt.err (!%p612_p5)  }
  0xba   :  { %154 = dma.hbm_to_vmem [thread:$0]  %s142_s0, 16, %s949_s19, [#allocation3] }
  0xbb   :  { %s376_s13 = sshll.u32 %s947_s21, 4  ;;  %s377_s10 = sld [smem:[#allocation5 + $0xa]] }
  0xbc   :  { %s158_s16 = scalar_lea.hbm %s1077_s1, %s376_s13 }
  0xbd   :  { %s616_s18 = scalar_lea.hbm %s158_s16, 16  ;;  %p619_p7 = scmp.lt.s32.totalorder %s158_s16, %s1077_s1 }
  0xbe   :  { %p617_p6 = scmp.ne.s32.totalorder %s158_s16, %s616_s18  ;;  %p620_p8 = scmp.lt.s32.totalorder %s853_s29, %s616_s18 }
  0xc0   :  { %p621_p9 = por %p620_p8, %p619_p7 }
  0xc2   :  { %p622_p10 = pnand %p621_p9, %p617_p6 }
  0xc4   :  { %625 = shalt.err (!%p622_p10)  }
  0xc5   :  { %s626_s19 = scalar_lea.vmem %s963_s3, 16  ;;  %p631_p12 = scmp.lt.s32.totalorder %s963_s3, %s836_s14 }
  0xc6   :  { %p627_p11 = scmp.ne.s32.totalorder %s963_s3, %s626_s19  ;;  %p632_p13 = scmp.lt.s32.totalorder %s862_s5, %s626_s19 }
  0xc8   :  { %p633_p0 = por %p632_p13, %p631_p12 }
  0xca   :  { %p634_p1 = pnand %p633_p0, %p627_p11 }
  0xcc   :  { %637 = shalt.err (!%p634_p1)  }
  0xcd   :  { %170 = dma.hbm_to_vmem [thread:$0]  %s158_s16, 16, %s963_s3, [#allocation3] }
  0xce   :  { %s807_s21 = smov [#allocation2 + $0xa]   ;;  %s379_s24 = sld [smem:[#allocation5 + $0xb]] }
  0xcf   :  { %s183_s17 = sshll.u32 %s807_s21, 4  ;;  %s808_s25 = smov [#allocation2 + $0xb]   ;;  %s184_s17 = int_to_ptr.vmem [resolvable:$true] %s183_s17 }
  0xd0   :  { %s199_s26 = sshll.u32 %s808_s25, 4  ;;  %s989_s27 = sld [smem:[#allocation5 + $0xc]]  ;;  %s991_s26 = int_to_ptr.vmem [resolvable:$true] %s199_s26 }
  0xd1   :  { %s378_s20 = sshll.u32 %s377_s10, 4 }
  0xd2   :  { %s174_s4 = scalar_lea.hbm %s1077_s1, %s378_s20 }
  0xd3   :  { %s638_s6 = scalar_lea.hbm %s174_s4, 16  ;;  %p641_p3 = scmp.lt.s32.totalorder %s174_s4, %s1077_s1 }
  0xd4   :  { %p639_p2 = scmp.ne.s32.totalorder %s174_s4, %s638_s6  ;;  %p642_p4 = scmp.lt.s32.totalorder %s853_s29, %s638_s6 }
  0xd6   :  { %p643_p5 = por %p642_p4, %p641_p3 }
  0xd8   :  { %p644_p6 = pnand %p643_p5, %p639_p2 }
  0xda   :  { %647 = shalt.err (!%p644_p6)  }
  0xdb   :  { %s648_s3 = scalar_lea.vmem %s184_s17, 16  ;;  %p653_p8 = scmp.lt.s32.totalorder %s184_s17, %s836_s14 }
  0xdc   :  { %p649_p7 = scmp.ne.s32.totalorder %s184_s17, %s648_s3  ;;  %p654_p9 = scmp.lt.s32.totalorder %s862_s5, %s648_s3 }
  0xde   :  { %p655_p10 = por %p654_p9, %p653_p8 }
  0xe0   :  { %p656_p11 = pnand %p655_p10, %p649_p7 }
  0xe2   :  { %659 = shalt.err (!%p656_p11)  }
  0xe3   :  { %186 = dma.hbm_to_vmem [thread:$0]  %s174_s4, 16, %s184_s17, [#allocation3] }
  0xe4   :  { %s380_s8 = sshll.u32 %s379_s24, 4  ;;  %s809_s9 = smov [#allocation2 + $0xc]  }
  0xe5   :  { %s215_s12 = sshll.u32 %s809_s9, 4  ;;  %s190_s11 = scalar_lea.hbm %s1077_s1, %s380_s8  ;;  %s1005_s12 = int_to_ptr.vmem [resolvable:$true] %s215_s12 }
  0xe6   :  { %s660_s15 = scalar_lea.hbm %s190_s11, 16  ;;  %p663_p13 = scmp.lt.s32.totalorder %s190_s11, %s1077_s1 }
  0xe7   :  { %p661_p12 = scmp.ne.s32.totalorder %s190_s11, %s660_s15  ;;  %p664_p0 = scmp.lt.s32.totalorder %s853_s29, %s660_s15 }
  0xe9   :  { %p665_p1 = por %p664_p0, %p663_p13 }
  0xeb   :  { %p666_p2 = pnand %p665_p1, %p661_p12 }
  0xed   :  { %669 = shalt.err (!%p666_p2)  }
  0xee   :  { %s670_s22 = scalar_lea.vmem %s991_s26, 16  ;;  %p675_p4 = scmp.lt.s32.totalorder %s991_s26, %s836_s14 }
  0xef   :  { %p671_p3 = scmp.ne.s32.totalorder %s991_s26, %s670_s22  ;;  %p676_p5 = scmp.lt.s32.totalorder %s862_s5, %s670_s22 }
  0xf1   :  { %p677_p6 = por %p676_p5, %p675_p4 }
  0xf3   :  { %p678_p7 = pnand %p677_p6, %p671_p3 }
  0xf5   :  { %681 = shalt.err (!%p678_p7)  }
  0xf6   :  { %202 = dma.hbm_to_vmem [thread:$0]  %s190_s11, 16, %s991_s26, [#allocation3] }
  0xf7   :  { %s382_s23 = sshll.u32 %s989_s27, 4  ;;  %s383_s19 = sld [smem:[#allocation5 + $0xd]] }
  0xf8   :  { %s206_s24 = scalar_lea.hbm %s1077_s1, %s382_s23 }
  0xf9   :  { %s682_s25 = scalar_lea.hbm %s206_s24, 16  ;;  %p685_p9 = scmp.lt.s32.totalorder %s206_s24, %s1077_s1 }
  0xfa   :  { %p683_p8 = scmp.ne.s32.totalorder %s206_s24, %s682_s25  ;;  %p686_p10 = scmp.lt.s32.totalorder %s853_s29, %s682_s25 }
  0xfc   :  { %p687_p11 = por %p686_p10, %p685_p9 }
  0xfe   :  { %p688_p12 = pnand %p687_p11, %p683_p8 }
 0x100   :  { %691 = shalt.err (!%p688_p12)  }
 0x101   :  { %s692_s26 = scalar_lea.vmem %s1005_s12, 16  ;;  %p697_p0 = scmp.lt.s32.totalorder %s1005_s12, %s836_s14 }
 0x102   :  { %p693_p13 = scmp.ne.s32.totalorder %s1005_s12, %s692_s26  ;;  %p698_p1 = scmp.lt.s32.totalorder %s862_s5, %s692_s26 }
 0x104   :  { %p699_p2 = por %p698_p1, %p697_p0 }
 0x106   :  { %p700_p3 = pnand %p699_p2, %p693_p13 }
 0x108   :  { %703 = shalt.err (!%p700_p3)  }
 0x109   :  { %218 = dma.hbm_to_vmem [thread:$0]  %s206_s24, 16, %s1005_s12, [#allocation3] }
 0x10a   :  { %s810_s27 = smov [#allocation2 + $0xd]   ;;  %s385_s4 = sld [smem:[#allocation5 + $0xe]] }
 0x10b   :  { %s231_s30 = sshll.u32 %s810_s27, 4  ;;  %s811_s6 = smov [#allocation2 + $0xe]   ;;  %s232_s30 = int_to_ptr.vmem [resolvable:$true] %s231_s30 }
 0x10c   :  { %s247_s0 = sshll.u32 %s811_s6, 4  ;;  %s1031_s7 = sld [smem:[#allocation5 + $0xf]]  ;;  %s1033_s0 = int_to_ptr.vmem [resolvable:$true] %s247_s0 }
 0x10d   :  { %s384_s3 = sshll.u32 %s383_s19, 4 }
 0x10e   :  { %s222_s13 = scalar_lea.hbm %s1077_s1, %s384_s3 }
 0x10f   :  { %s704_s10 = scalar_lea.hbm %s222_s13, 16  ;;  %p707_p5 = scmp.lt.s32.totalorder %s222_s13, %s1077_s1 }
 0x110   :  { %p705_p4 = scmp.ne.s32.totalorder %s222_s13, %s704_s10  ;;  %p708_p6 = scmp.lt.s32.totalorder %s853_s29, %s704_s10 }
 0x112   :  { %p709_p7 = por %p708_p6, %p707_p5 }
 0x114   :  { %p710_p8 = pnand %p709_p7, %p705_p4 }
 0x116   :  { %713 = shalt.err (!%p710_p8)  }
 0x117   :  { %s714_s12 = scalar_lea.vmem %s232_s30, 16  ;;  %p719_p10 = scmp.lt.s32.totalorder %s232_s30, %s836_s14 }
 0x118   :  { %p715_p9 = scmp.ne.s32.totalorder %s232_s30, %s714_s12  ;;  %p720_p11 = scmp.lt.s32.totalorder %s862_s5, %s714_s12 }
 0x11a   :  { %p721_p12 = por %p720_p11, %p719_p10 }
 0x11c   :  { %p722_p13 = pnand %p721_p12, %p715_p9 }
 0x11e   :  { %725 = shalt.err (!%p722_p13)  }
 0x11f   :  { %234 = dma.hbm_to_vmem [thread:$0]  %s222_s13, 16, %s232_s30, [#allocation3] }
 0x120   :  { %s386_s16 = sshll.u32 %s385_s4, 4  ;;  %s812_s18 = smov [#allocation2 + $0xf]  }
 0x121   :  { %s263_s22 = sshll.u32 %s812_s18, 4  ;;  %s238_s21 = scalar_lea.hbm %s1077_s1, %s386_s16  ;;  %s1047_s22 = int_to_ptr.vmem [resolvable:$true] %s263_s22 }
 0x122   :  { %s726_s17 = scalar_lea.hbm %s238_s21, 16  ;;  %p729_p1 = scmp.lt.s32.totalorder %s238_s21, %s1077_s1 }
 0x123   :  { %p727_p0 = scmp.ne.s32.totalorder %s238_s21, %s726_s17  ;;  %p730_p2 = scmp.lt.s32.totalorder %s853_s29, %s726_s17 }
 0x125   :  { %p731_p3 = por %p730_p2, %p729_p1 }
 0x127   :  { %p732_p4 = pnand %p731_p3, %p727_p0 }
 0x129   :  { %735 = shalt.err (!%p732_p4)  }
 0x12a   :  { %s736_s20 = scalar_lea.vmem %s1033_s0, 16  ;;  %p741_p6 = scmp.lt.s32.totalorder %s1033_s0, %s836_s14 }
 0x12b   :  { %p737_p5 = scmp.ne.s32.totalorder %s1033_s0, %s736_s20  ;;  %p742_p7 = scmp.lt.s32.totalorder %s862_s5, %s736_s20 }
 0x12d   :  { %p743_p8 = por %p742_p7, %p741_p6 }
 0x12f   :  { %p744_p9 = pnand %p743_p8, %p737_p5 }
 0x131   :  { %747 = shalt.err (!%p744_p9)  }
 0x132   :  { %250 = dma.hbm_to_vmem [thread:$0]  %s238_s21, 16, %s1033_s0, [#allocation3] }
 0x133   :  { %s388_s28 = sshll.u32 %s1031_s7, 4 }
 0x134   :  { %s254_s30 = scalar_lea.hbm %s1077_s1, %s388_s28 }
 0x135   :  { %s748_s4 = scalar_lea.hbm %s254_s30, 16  ;;  %p751_p11 = scmp.lt.s32.totalorder %s254_s30, %s1077_s1 }
 0x136   :  { %p749_p10 = scmp.ne.s32.totalorder %s254_s30, %s748_s4  ;;  %p752_p12 = scmp.lt.s32.totalorder %s853_s29, %s748_s4 }
 0x138   :  { %p753_p13 = por %p752_p12, %p751_p11 }
 0x13a   :  { %p754_p0 = pnand %p753_p13, %p749_p10 }
 0x13c   :  { %757 = shalt.err (!%p754_p0)  }
 0x13d   :  { %s758_s0 = scalar_lea.vmem %s1047_s22, 16  ;;  %p763_p2 = scmp.lt.s32.totalorder %s1047_s22, %s836_s14 }
 0x13e   :  { %p759_p1 = scmp.ne.s32.totalorder %s1047_s22, %s758_s0  ;;  %p764_p3 = scmp.lt.s32.totalorder %s862_s5, %s758_s0 }
 0x140   :  { %p765_p4 = por %p764_p3, %p763_p2 }
 0x142   :  { %p766_p5 = pnand %p765_p4, %p759_p1 }
 0x144   :  { %769 = shalt.err (!%p766_p5)  }
 0x145   :  { %266 = dma.hbm_to_vmem [thread:$0]  %s254_s30, 16, %s1047_s22, [#allocation3] }
 0x146   :  { %792 = dma.done.wait [#allocation3], 256 }
 0x147   :  { %793 = vsyncadd [#allocation3], 4294967040  ;;  %s813_s1 = smov [#allocation6]   ;;  %v300_v0 = vld [vmem:[#allocation2] sm:$0xff]  ;;  %v301_v1 = vld [vmem:[#allocation2 + $0x8] sm:$0xff] }
 0x148   :  { %s309_s29 = sshll.u32 %s813_s1, 4  ;;  %302 = vst [vmem:[#allocation6] sm:$0xff] %v300_v0  ;;  %303 = vst [vmem:[#allocation6 + $0x8] sm:$0xff] %v301_v1  ;;  %s310_s29 = int_to_ptr.vmem [resolvable:$true] %s309_s29 }
 0x149   :  { %s770_s7 = scalar_lea.vmem %s310_s29, 256  ;;  %p775_p7 = scmp.lt.s32.totalorder %s310_s29, %s310_s29 }
 0x14a   :  { %p771_p6 = scmp.ne.s32.totalorder %s310_s29, %s770_s7  ;;  %p776_p8 = scmp.lt.s32.totalorder %s770_s7, %s770_s7 }
 0x14c   :  { %p777_p9 = por %p776_p8, %p775_p7 }
 0x14e   :  { %p778_p10 = pnand %p777_p9, %p771_p6 }
 0x150   :  { %781 = shalt.err (!%p778_p10)
}
 0x151   :  { %s814_s14 = smov 128   ;;  %s815_s5 = smov 8  }
 0x152   :  { %315 = dma.vmem_to_hbm [thread:$0]  %s310_s29, 256, %s1078_s2, [#allocation7], %s814_s14, %s814_s14, %s815_s5  }
 0x153   :  { %794 = dma.done.wait [#allocation7], 256  }
 0x154   :  { %795 = vsyncadd [#allocation7], 4294967040 }
 0x155   :  { %319 = vsyncpa [#allocation7], 1 }
 0x156   :  { %320 = vsyncmov [#allocation3] }
 0x159   :  { %s321_s13 = vpop.sfrf %320 }
 0x15a   :  { %p389_p11 = scmp.ne.s32.totalorder %s321_s13, 0 }
 0x15c   :  { %325 = shalt.err (%p389_p11)  }

</bundles_post_ra>
